<compile_context>
chip_gen: v6e
topology: v6e:2x2x1
jax: 0.10.0
libtpu: 0.0.40
codegen_flags: <defaults>
</compile_context>

<pallas_src>
from functools import lru_cache

import jax
import jax.numpy as jnp
import numpy as np
from jax import lax
from jax.experimental import pallas as pl
from jax.experimental.pallas import tpu as pltpu


def cb_agent_kernel(
    sd_ref,      # (2H, B*N)  stacked activations: rows [0:H]=static, [H:2H]=dynamic,
                 #            column b*N+n = feature vector of node n in batch b
    xh_ref,      # (B, 2H)    [GRU input x | previous hidden h0]
    gru_ref,     # (2H+1, 4H) merged GRU weight (rows 0:2H) + folded bias (row 2H)
    attn_ref,    # (3H+1, 2H) rows[0:H]=[W_s|W_d], rows[H:2H]=[W_e|0], rows[2H:3H]=[W_r|W_c],
                 #            row[3H]=[v_attn | v_agent]
    ef_ref,      # (N+B, B*N) rows[0:N]=F^T (fold 0/1), rows[N:N+B]=E (segment 0/1)
    out_ref,     # (B, OUT_W) packed output: [:, :N] = probs, [:, N:N+H] = new hidden
):
    B, twoH = xh_ref.shape
    H = twoH // 2
    BN = sd_ref.shape[1]
    N = BN // B
    f32 = jnp.float32

    # ---------------- GRU cell (seq_len == 1, num_layers == 1), single matmul ------------
    xh = xh_ref[...]                                                      # (B, 2H)
    h0 = xh[:, H:]
    g = (jnp.dot(xh, gru_ref[:2 * H, :], preferred_element_type=f32)
         + gru_ref[2 * H:2 * H + 1, :])                                   # (B, 4H)
    r = jax.nn.sigmoid(g[:, :H])
    z = jax.nn.sigmoid(g[:, H:2 * H])
    n = jnp.tanh(g[:, 2 * H:3 * H] + r * g[:, 3 * H:])
    h_new = (1.0 - z) * n + z * h0                                        # (B, H)

    # ---------------- carve packed slabs (static slices, zero cost) ----------------------
    w_stack = attn_ref[:2 * H, :]                                         # (2H, 2H)
    w_r = attn_ref[2 * H:3 * H, :H]                                       # (H, H)
    w_c = attn_ref[2 * H:3 * H, H:]                                       # (H, H)
    v_attn = attn_ref[3 * H:3 * H + 1, :H]                                # (1, H)
    v_agent = attn_ref[3 * H:3 * H + 1, H:]                               # (1, H)
    F_T = ef_ref[:N, :]                                                   # (N, BN)
    E = ef_ref[N:, :]                                                     # (B, BN)

    sd = sd_ref[...]                                                      # (2H, BN)
    s2d = sd[:H, :]                                                       # static half

    # ---------------- encoder attention (fused static+dynamic+agent-static proj) ---------
    proj = jnp.dot(w_stack, sd, preferred_element_type=f32)               # (2H, BN)
    rnn_t = lax.dot_general(w_r, h_new, (((1,), (1,)), ((), ())),
                            preferred_element_type=f32)                   # (H, B)
    rnn_b = jnp.dot(rnn_t, E, preferred_element_type=f32)                 # (H, BN)

    t = jnp.tanh(proj[:H, :] + rnn_b)                                     # (H, BN)
    logits = jnp.dot(v_attn, t, preferred_element_type=f32)               # (1, BN)

    # per-batch (segment) softmax — numerically identical to jax.nn.softmax per batch
    lm = jnp.where(E > 0.0, logits, -jnp.inf)                             # (B, BN)
    m_b = jnp.max(lm, axis=1, keepdims=True)                              # (B, 1)
    m_bc = jnp.sum(jnp.where(E > 0.0, m_b, 0.0), axis=0, keepdims=True)   # (1, BN)
    e = jnp.exp(logits - m_bc)                                            # (1, BN)
    e_sum = lax.dot_general(e, E, (((1,), (1,)), ((), ())),
                            preferred_element_type=f32)                   # (1, B)
    denom = jnp.dot(e_sum, E, preferred_element_type=f32)                 # (1, BN)
    attn = e / denom                                                      # exact

    # ---------------- context + pointer scores -------------------------------------------
    ctx = lax.dot_general(s2d * attn, E, (((1,), (1,)), ((), ())),
                          preferred_element_type=f32)                     # (H, B)
    ctx_t = jnp.dot(w_c, ctx, preferred_element_type=f32)                 # (H, B)
    ctx_b = jnp.dot(ctx_t, E, preferred_element_type=f32)                 # (H, BN)

    t2 = jnp.tanh(proj[H:, :] + ctx_b)                                    # (H, BN)
    probs_flat = jnp.dot(v_agent, t2, preferred_element_type=f32)         # (1, BN)
    probs = lax.dot_general(E * probs_flat, F_T, (((1,), (1,)), ((), ())),
                            preferred_element_type=f32)                   # (B, N)

    # ---------------- single lane-dense packed store: [probs | h_new | pad] --------------
    pad_w = out_ref.shape[1] - (N + H)
    pieces = [probs, h_new]
    if pad_w > 0:
        pieces.append(jnp.zeros((B, pad_w), f32))
    out_ref[...] = jnp.concatenate(pieces, axis=1)


def init_params(key, hidden_size):
    H = hidden_size
    ks = jax.random.split(key, 8)
    s = 0.1
    return dict(
        gru_w_ih=s * jax.random.normal(ks[0], (3 * H, H), jnp.float32),
        gru_w_hh=s * jax.random.normal(ks[1], (3 * H, H), jnp.float32),
        gru_b_ih=s * jax.random.normal(ks[2], (3 * H,), jnp.float32),
        gru_b_hh=s * jax.random.normal(ks[3], (3 * H,), jnp.float32),
        attn_v=s * jax.random.normal(ks[4], (1, 1, H), jnp.float32),
        attn_W=s * jax.random.normal(ks[5], (1, H, 3 * H), jnp.float32),
        agent_v=s * jax.random.normal(ks[6], (1, 1, H), jnp.float32),
        agent_W=s * jax.random.normal(ks[7], (1, H, 2 * H), jnp.float32),
    )


def pack_params(params):
    """One-time weight preprocessing: two VMEM slabs, everything else pre-folded."""
    H = params["gru_w_ih"].shape[1]
    f32 = jnp.float32

    # ---- GRU: merged [x|h0] @ (2H,4H) block weight + folded (1,4H) bias, one slab -------
    wih_t = jnp.asarray(params["gru_w_ih"].T)                              # (H, 3H) [r|z|n]
    whh_t = jnp.asarray(params["gru_w_hh"].T)                              # (H, 3H)
    zeros_hh = jnp.zeros((H, H), f32)
    w_top = jnp.concatenate([wih_t[:, :2 * H], wih_t[:, 2 * H:], zeros_hh], axis=1)  # (H,4H)
    w_bot = jnp.concatenate([whh_t[:, :2 * H], zeros_hh, whh_t[:, 2 * H:]], axis=1)  # (H,4H)
    b = jnp.concatenate(
        [params["gru_b_ih"][:2 * H] + params["gru_b_hh"][:2 * H],
         params["gru_b_ih"][2 * H:],
         params["gru_b_hh"][2 * H:]], axis=0)[None, :]                               # (1,4H)
    gru_slab = jnp.concatenate([w_top, w_bot, b], axis=0)                            # (2H+1,4H)

    # ---- attention/agent weights into one slab (3H+1, 2H) --------------------------------
    W_a = params["attn_W"][0]       # (H, 3H) = [W_s | W_d | W_r]
    W_g = params["agent_W"][0]      # (H, 2H) = [W_e | W_c]
    row0 = jnp.concatenate([W_a[:, :H], W_a[:, H:2 * H]], axis=1)                    # [W_s|W_d]
    row1 = jnp.concatenate([W_g[:, :H], jnp.zeros((H, H), f32)], axis=1)             # [W_e|0]
    row2 = jnp.concatenate([W_a[:, 2 * H:], W_g[:, H:]], axis=1)                     # [W_r|W_c]
    row3 = jnp.concatenate([params["attn_v"][0], params["agent_v"][0]], axis=1)      # [v_a|v_g]
    attn_slab = jnp.concatenate([row0, row1, row2, row3], axis=0)                    # (3H+1,2H)

    return dict(gru=gru_slab, attn=attn_slab)


@lru_cache(maxsize=None)
def _segment_slab(B, N):
    """Precomputed 0/1 fold/segment matrices, cached per (B, N): rows[0:N]=F^T, rows[N:]=E."""
    BN = B * N
    j = np.arange(BN)
    F_T = (j[None, :] % N == np.arange(N)[:, None]).astype(np.float32)    # (N, BN)
    E = (j[None, :] // N == np.arange(B)[:, None]).astype(np.float32)     # (B, BN)
    return np.concatenate([F_T, E], axis=0)                               # (N+B, BN)


@jax.jit
def cb_agent_forward(packed, static_hidden, dynamic_hidden, decoder_hidden, last_hh):
    B, H, N = static_hidden.shape
    x = decoder_hidden[:, :, 0]                    # (B, H)
    h0 = last_hh[0]                                # (B, H)
    xh = jnp.concatenate([x, h0], axis=1)          # (B, 2H)
    # Lane-batched stacked activations (2H, B*N); col b*N+n = node n of batch b.
    sd = jnp.concatenate(
        [jnp.transpose(static_hidden, (1, 0, 2)).reshape(H, B * N),
         jnp.transpose(dynamic_hidden, (1, 0, 2)).reshape(H, B * N)], axis=0)
    ef = _segment_slab(B, N)                       # compile-time constant under jit
    out_w = max(128, ((N + H + 127) // 128) * 128)

    slab = pl.pallas_call(
        cb_agent_kernel,
        out_shape=jax.ShapeDtypeStruct((B, out_w), jnp.float32),
        in_specs=[pl.BlockSpec(memory_space=pltpu.MemorySpace.VMEM)] * 5,
        out_specs=pl.BlockSpec(memory_space=pltpu.MemorySpace.VMEM),
    )(sd, xh, packed["gru"], packed["attn"], ef)
    probs = slab[:, :N]                            # (B, N)
    hh = slab[:, N:N + H]                          # (B, H)
    return probs, hh[None]                         # probs (B, N), last_hh (1, B, H)


def reference_forward(params, static_hidden, dynamic_hidden, decoder_hidden, last_hh):
    """Pure-JAX mirror of the PyTorch forward (dropout = identity)."""
    B, H, N = static_hidden.shape
    x = decoder_hidden[:, :, 0]
    h0 = last_hh[0]
    gi = x @ params["gru_w_ih"].T + params["gru_b_ih"]
    gh = h0 @ params["gru_w_hh"].T + params["gru_b_hh"]
    r = jax.nn.sigmoid(gi[:, :H] + gh[:, :H])
    z = jax.nn.sigmoid(gi[:, H:2 * H] + gh[:, H:2 * H])
    n = jnp.tanh(gi[:, 2 * H:] + r * gh[:, 2 * H:])
    h_new = (1.0 - z) * n + z * h0                                                 # (B, H)

    hidden = jnp.concatenate(
        [static_hidden, dynamic_hidden,
         jnp.broadcast_to(h_new[:, :, None], (B, H, N))], axis=1)                  # (B, 3H, N)
    W_a = params["attn_W"][0]
    v_a = params["attn_v"][0]
    t = jnp.tanh(jnp.einsum("hk,bkn->bhn", W_a, hidden))
    attn = jax.nn.softmax(jnp.einsum("oh,bhn->bon", v_a, t), axis=2)               # (B, 1, N)
    ctx = jnp.einsum("bon,bhn->boh", attn, static_hidden)                          # (B, 1, H)
    energy = jnp.concatenate(
        [static_hidden,
         jnp.broadcast_to(jnp.transpose(ctx, (0, 2, 1)), (B, H, N))], axis=1)      # (B, 2H, N)
    W_g = params["agent_W"][0]
    v_g = params["agent_v"][0]
    probs = jnp.einsum("oh,bhn->bon", v_g,
                       jnp.tanh(jnp.einsum("hk,bkn->bhn", W_g, energy)))[:, 0, :]
    return probs, h_new[None]


if __name__ == "__main__":
    key = jax.random.PRNGKey(0)
    B, H, N = 2, 32, 16  # batch, hidden_size, num nodes

    kp, k1, k2, k3, k4 = jax.random.split(key, 5)
    params = init_params(kp, H)
    static_hidden = jax.random.normal(k1, (B, H, N), jnp.float32)
    dynamic_hidden = jax.random.normal(k2, (B, H, N), jnp.float32)
    decoder_hidden = jax.random.normal(k3, (B, H, 1), jnp.float32)
    last_hh = jax.random.normal(k4, (1, B, H), jnp.float32)

    packed = pack_params(params)   # one-time weight prep (outside the per-step path)

    probs, new_hh = cb_agent_forward(packed, static_hidden, dynamic_hidden,
                                     decoder_hidden, last_hh)
    jax.block_until_ready((probs, new_hh))

    ref_probs, ref_hh = reference_forward(params, static_hidden, dynamic_hidden,
                                          decoder_hidden, last_hh)
    np.testing.assert_allclose(np.asarray(probs), np.asarray(ref_probs), atol=1e-4, rtol=1e-4)
    np.testing.assert_allclose(np.asarray(new_hh), np.asarray(ref_hh), atol=1e-4, rtol=1e-4)

    print("KERNEL_OK")
</pallas_src>

<mosaic_0001>
module attributes {stable_mosaic.version = 11 : i64} {
  func.func @cb_agent_kernel(%arg0: memref<64x32xf32, #tpu.memory_space<vmem>>, %arg1: memref<2x64xf32, #tpu.memory_space<vmem>>, %arg2: memref<65x128xf32, #tpu.memory_space<vmem>>, %arg3: memref<97x64xf32, #tpu.memory_space<vmem>>, %arg4: memref<18x32xf32, #tpu.memory_space<vmem>>, %arg5: memref<2x128xf32, #tpu.memory_space<vmem>>) attributes {dimension_semantics = [], scalar_prefetch = 0 : i64, scratch_operands = 0 : i64, tpu.core_type = #tpu.core_type<tc>} {
    %c0 = arith.constant 0 : index
    %c0_0 = arith.constant 0 : index
    %0 = vector.load %arg1[%c0, %c0_0] : memref<2x64xf32, #tpu.memory_space<vmem>>, vector<2x64xf32>
    %1 = vector.extract_strided_slice %0 {offsets = [0, 32], sizes = [2, 32], strides = [1, 1]} : vector<2x64xf32> to vector<2x32xf32>
    %c0_1 = arith.constant 0 : index
    %c0_2 = arith.constant 0 : index
    %2 = vector.load %arg2[%c0_1, %c0_2] : memref<65x128xf32, #tpu.memory_space<vmem>>, vector<64x128xf32>
    %cst = arith.constant dense<0.000000e+00> : vector<2x128xf32>
    %3 = tpu.matmul %0, %2, %cst {dimension_numbers = #tpu.dot_dimension_numbers<[1], [0], [0], [1], [0, 0, 1, 1], [], []>} : vector<2x64xf32>, vector<64x128xf32>, vector<2x128xf32> -> vector<2x128xf32>
    %c64 = arith.constant 64 : index
    %c0_3 = arith.constant 0 : index
    %4 = vector.load %arg2[%c64, %c0_3] : memref<65x128xf32, #tpu.memory_space<vmem>>, vector<1x128xf32>
    %5 = vector.broadcast %4 : vector<1x128xf32> to vector<2x128xf32>
    %6 = arith.addf %3, %5 : vector<2x128xf32>
    %7 = vector.extract_strided_slice %6 {offsets = [0, 0], sizes = [2, 32], strides = [1, 1]} : vector<2x128xf32> to vector<2x32xf32>
    %8 = arith.negf %7 : vector<2x32xf32>
    %9 = math.exp %8 : vector<2x32xf32>
    %cst_4 = arith.constant 1.000000e+00 : f32
    %10 = vector.broadcast %cst_4 : f32 to vector<2x32xf32>
    %11 = arith.addf %10, %9 : vector<2x32xf32>
    %12 = arith.divf %10, %11 : vector<2x32xf32>
    %13 = vector.extract_strided_slice %6 {offsets = [0, 32], sizes = [2, 32], strides = [1, 1]} : vector<2x128xf32> to vector<2x32xf32>
    %14 = arith.negf %13 : vector<2x32xf32>
    %15 = math.exp %14 : vector<2x32xf32>
    %cst_5 = arith.constant 1.000000e+00 : f32
    %16 = vector.broadcast %cst_5 : f32 to vector<2x32xf32>
    %17 = arith.addf %16, %15 : vector<2x32xf32>
    %18 = arith.divf %16, %17 : vector<2x32xf32>
    %19 = vector.extract_strided_slice %6 {offsets = [0, 64], sizes = [2, 32], strides = [1, 1]} : vector<2x128xf32> to vector<2x32xf32>
    %20 = vector.extract_strided_slice %6 {offsets = [0, 96], sizes = [2, 32], strides = [1, 1]} : vector<2x128xf32> to vector<2x32xf32>
    %21 = arith.mulf %12, %20 : vector<2x32xf32>
    %22 = arith.addf %19, %21 : vector<2x32xf32>
    %23 = math.tanh %22 : vector<2x32xf32>
    %cst_6 = arith.constant 1.000000e+00 : f32
    %24 = vector.broadcast %cst_6 : f32 to vector<2x32xf32>
    %25 = arith.subf %24, %18 : vector<2x32xf32>
    %26 = arith.mulf %25, %23 : vector<2x32xf32>
    %27 = arith.mulf %18, %1 : vector<2x32xf32>
    %28 = arith.addf %26, %27 : vector<2x32xf32>
    %c0_7 = arith.constant 0 : index
    %c0_8 = arith.constant 0 : index
    %29 = vector.load %arg3[%c0_7, %c0_8] : memref<97x64xf32, #tpu.memory_space<vmem>>, vector<64x64xf32>
    %c64_9 = arith.constant 64 : index
    %c0_10 = arith.constant 0 : index
    %30 = vector.load %arg3[%c64_9, %c0_10] : memref<97x64xf32, #tpu.memory_space<vmem>>, vector<32x32xf32>
    %c64_11 = arith.constant 64 : index
    %c32 = arith.constant 32 : index
    %31 = vector.load %arg3[%c64_11, %c32] : memref<97x64xf32, #tpu.memory_space<vmem>>, vector<32x32xf32>
    %c96 = arith.constant 96 : index
    %c0_12 = arith.constant 0 : index
    %32 = vector.load %arg3[%c96, %c0_12] : memref<97x64xf32, #tpu.memory_space<vmem>>, vector<1x32xf32>
    %c96_13 = arith.constant 96 : index
    %c32_14 = arith.constant 32 : index
    %33 = vector.load %arg3[%c96_13, %c32_14] : memref<97x64xf32, #tpu.memory_space<vmem>>, vector<1x32xf32>
    %c0_15 = arith.constant 0 : index
    %c0_16 = arith.constant 0 : index
    %34 = vector.load %arg4[%c0_15, %c0_16] : memref<18x32xf32, #tpu.memory_space<vmem>>, vector<16x32xf32>
    %c16 = arith.constant 16 : index
    %c0_17 = arith.constant 0 : index
    %35 = vector.load %arg4[%c16, %c0_17] : memref<18x32xf32, #tpu.memory_space<vmem>>, vector<2x32xf32>
    %c0_18 = arith.constant 0 : index
    %c0_19 = arith.constant 0 : index
    %36 = vector.load %arg0[%c0_18, %c0_19] : memref<64x32xf32, #tpu.memory_space<vmem>>, vector<64x32xf32>
    %37 = vector.extract_strided_slice %36 {offsets = [0, 0], sizes = [32, 32], strides = [1, 1]} : vector<64x32xf32> to vector<32x32xf32>
    %cst_20 = arith.constant dense<0.000000e+00> : vector<64x32xf32>
    %38 = tpu.matmul %29, %36, %cst_20 {dimension_numbers = #tpu.dot_dimension_numbers<[1], [0], [0], [1], [0, 0, 1, 1], [], []>} : vector<64x64xf32>, vector<64x32xf32>, vector<64x32xf32> -> vector<64x32xf32>
    %cst_21 = arith.constant dense<0.000000e+00> : vector<32x2xf32>
    %39 = tpu.matmul %30, %28, %cst_21 {dimension_numbers = #tpu.dot_dimension_numbers<[1], [1], [0], [0], [0, 0, 1, 0], [], []>} : vector<32x32xf32>, vector<2x32xf32>, vector<32x2xf32> -> vector<32x2xf32>
    %cst_22 = arith.constant dense<0.000000e+00> : vector<32x32xf32>
    %40 = tpu.matmul %39, %35, %cst_22 {dimension_numbers = #tpu.dot_dimension_numbers<[1], [0], [0], [1], [0, 0, 1, 1], [], []>} : vector<32x2xf32>, vector<2x32xf32>, vector<32x32xf32> -> vector<32x32xf32>
    %41 = vector.extract_strided_slice %38 {offsets = [0, 0], sizes = [32, 32], strides = [1, 1]} : vector<64x32xf32> to vector<32x32xf32>
    %42 = arith.addf %41, %40 : vector<32x32xf32>
    %43 = math.tanh %42 : vector<32x32xf32>
    %cst_23 = arith.constant dense<0.000000e+00> : vector<1x32xf32>
    %44 = tpu.matmul %32, %43, %cst_23 {dimension_numbers = #tpu.dot_dimension_numbers<[1], [0], [0], [1], [0, 0, 1, 1], [], []>} : vector<1x32xf32>, vector<32x32xf32>, vector<1x32xf32> -> vector<1x32xf32>
    %cst_24 = arith.constant 0.000000e+00 : f32
    %45 = vector.broadcast %cst_24 : f32 to vector<2x32xf32>
    %46 = arith.cmpf ogt, %35, %45 : vector<2x32xf32>
    %cst_25 = arith.constant 0xFF800000 : f32
    %47 = vector.shape_cast %44 : vector<1x32xf32> to vector<1x32xf32>
    %48 = vector.broadcast %47 : vector<1x32xf32> to vector<2x32xf32>
    %49 = vector.broadcast %cst_25 : f32 to vector<2x32xf32>
    %50 = arith.select %46, %48, %49 : vector<2x32xi1>, vector<2x32xf32>
    %cst_26 = arith.constant dense<0xFF800000> : vector<2xf32>
    %51 = vector.multi_reduction <maximumf>, %50, %cst_26 [1] : vector<2x32xf32> to vector<2xf32>
    %52 = vector.shape_cast %51 : vector<2xf32> to vector<2x1xf32>
    %cst_27 = arith.constant 0.000000e+00 : f32
    %53 = vector.broadcast %cst_27 : f32 to vector<2x32xf32>
    %54 = arith.cmpf ogt, %35, %53 : vector<2x32xf32>
    %cst_28 = arith.constant 0.000000e+00 : f32
    %55 = vector.shape_cast %52 : vector<2x1xf32> to vector<2x1xf32>
    %56 = vector.broadcast %55 : vector<2x1xf32> to vector<2x32xf32>
    %57 = vector.broadcast %cst_28 : f32 to vector<2x32xf32>
    %58 = arith.select %54, %56, %57 : vector<2x32xi1>, vector<2x32xf32>
    %cst_29 = arith.constant dense<0.000000e+00> : vector<32xf32>
    %59 = vector.multi_reduction <add>, %58, %cst_29 [0] : vector<2x32xf32> to vector<32xf32>
    %60 = vector.shape_cast %59 : vector<32xf32> to vector<1x32xf32>
    %61 = arith.subf %44, %60 : vector<1x32xf32>
    %62 = math.exp %61 : vector<1x32xf32>
    %cst_30 = arith.constant dense<0.000000e+00> : vector<1x2xf32>
    %63 = tpu.matmul %62, %35, %cst_30 {dimension_numbers = #tpu.dot_dimension_numbers<[1], [1], [0], [0], [0, 0, 1, 0], [], []>} : vector<1x32xf32>, vector<2x32xf32>, vector<1x2xf32> -> vector<1x2xf32>
    %cst_31 = arith.constant dense<0.000000e+00> : vector<1x32xf32>
    %64 = tpu.matmul %63, %35, %cst_31 {dimension_numbers = #tpu.dot_dimension_numbers<[1], [0], [0], [1], [0, 0, 1, 1], [], []>} : vector<1x2xf32>, vector<2x32xf32>, vector<1x32xf32> -> vector<1x32xf32>
    %65 = arith.divf %62, %64 : vector<1x32xf32>
    %66 = vector.broadcast %65 : vector<1x32xf32> to vector<32x32xf32>
    %67 = arith.mulf %37, %66 : vector<32x32xf32>
    %cst_32 = arith.constant dense<0.000000e+00> : vector<32x2xf32>
    %68 = tpu.matmul %67, %35, %cst_32 {dimension_numbers = #tpu.dot_dimension_numbers<[1], [1], [0], [0], [0, 0, 1, 0], [], []>} : vector<32x32xf32>, vector<2x32xf32>, vector<32x2xf32> -> vector<32x2xf32>
    %cst_33 = arith.constant dense<0.000000e+00> : vector<32x2xf32>
    %69 = tpu.matmul %31, %68, %cst_33 {dimension_numbers = #tpu.dot_dimension_numbers<[1], [0], [0], [1], [0, 0, 1, 1], [], []>} : vector<32x32xf32>, vector<32x2xf32>, vector<32x2xf32> -> vector<32x2xf32>
    %cst_34 = arith.constant dense<0.000000e+00> : vector<32x32xf32>
    %70 = tpu.matmul %69, %35, %cst_34 {dimension_numbers = #tpu.dot_dimension_numbers<[1], [0], [0], [1], [0, 0, 1, 1], [], []>} : vector<32x2xf32>, vector<2x32xf32>, vector<32x32xf32> -> vector<32x32xf32>
    %71 = vector.extract_strided_slice %38 {offsets = [32, 0], sizes = [32, 32], strides = [1, 1]} : vector<64x32xf32> to vector<32x32xf32>
    %72 = arith.addf %71, %70 : vector<32x32xf32>
    %73 = math.tanh %72 : vector<32x32xf32>
    %cst_35 = arith.constant dense<0.000000e+00> : vector<1x32xf32>
    %74 = tpu.matmul %33, %73, %cst_35 {dimension_numbers = #tpu.dot_dimension_numbers<[1], [0], [0], [1], [0, 0, 1, 1], [], []>} : vector<1x32xf32>, vector<32x32xf32>, vector<1x32xf32> -> vector<1x32xf32>
    %75 = vector.broadcast %74 : vector<1x32xf32> to vector<2x32xf32>
    %76 = arith.mulf %35, %75 : vector<2x32xf32>
    %cst_36 = arith.constant dense<0.000000e+00> : vector<2x16xf32>
    %77 = tpu.matmul %76, %34, %cst_36 {dimension_numbers = #tpu.dot_dimension_numbers<[1], [1], [0], [0], [0, 0, 1, 0], [], []>} : vector<2x32xf32>, vector<16x32xf32>, vector<2x16xf32> -> vector<2x16xf32>
    %cst_37 = arith.constant 0.000000e+00 : f32
    %78 = vector.broadcast %cst_37 : f32 to vector<2x80xf32>
    %79 = tpu.concatenate %77, %28, %78 in 1 : vector<2x16xf32>, vector<2x32xf32>, vector<2x80xf32> -> vector<2x128xf32>
    %c0_38 = arith.constant 0 : index
    %c0_39 = arith.constant 0 : index
    %80 = vector.load %arg5[%c0_38, %c0_39] : memref<2x128xf32, #tpu.memory_space<vmem>>, vector<2x128xf32>
    tpu.vector_store %arg5[%c0_38, %c0_39], %79 {strides = array<i32>} : memref<2x128xf32, #tpu.memory_space<vmem>>, vector<2x128xf32>,
    return
  }
}

</mosaic_0001>

<bundles_post_ra>
// kernel: cb_agent_forward.1
= control target key start
LH: loop header
LB: loop body
LE: loop exit
PB: predicated region body
PF: predicated region fallthrough
CT: control target
= control target key end

     0   :  { %v1502_v0 = vmov 0.0   ;;  %vm1503_vm0 = vmmov 0   ;;  %vm34_vm1 = vcmask 523264   ;;  %s1504_s13 = smov 32   ;;  %vm289_vm2 = vcmask 261120   ;;  %s1507_s14 = smov 112   ;;  %s1781_s2 = inlined_call_operand.vmem [shape: f32[65,128], index: 2, kind: input, shape index: {}]   ;;  %s1782_s1 = inlined_call_operand.vmem [shape: f32[2,64], index: 1, kind: input, shape index: {}]   ;;  %s1783_s3 = inlined_call_operand.vmem [shape: f32[97,64], index: 3, kind: input, shape index: {}]   ;;  %s1784_s0 = inlined_call_operand.vmem [shape: f32[64,32], index: 0, kind: input, shape index: {}]   ;;  %s1785_s4 = inlined_call_operand.vmem [shape: f32[18,32], index: 4, kind: input, shape index: {}]   ;;  %s1786_s5 = inlined_call_operand.vmem [shape: f32[2,128], index: 5, kind: output, shape index: {}]  }
   0x1   :  { %1338 = vmatprep.subr.mxu0 %v1502_v0  ;;  %v28_v1 = vld [vmem:[%s1781_s2 + $0x38] sm:$0xff]  ;;  %v27_v2 = vld [vmem:[%s1781_s2 + $0x30] sm:$0xff]  ;;  %1354 = vmatprep.mubr.msk.f32.mxu0 %vm1503_vm0, %v1502_v0  ;;  %v26_v3 = vld [vmem:[%s1781_s2 + $0x28] sm:$0xff]  ;;  %vm402_vm3 = vcmask 1041408   ;;  %vm389_vm4 = vcmask 15360   ;;  %vm578_vm6 = vcmask 254976  }
   0x2   :  { %1339 = vmatpush3.msra.mxu0 %v28_v1  ;;  %v25_v4 = vld [vmem:[%s1781_s2 + $0x20] sm:$0xff]  ;;  %v24_v5 = vld [vmem:[%s1781_s2 + $0x18] sm:$0xff]  ;;  %v23_v6 = vld [vmem:[%s1781_s2 + $0x10] sm:$0xff]  ;;  %vm1215_vm7 = vcmask 130048   ;;  %vm1217_vm8 = vcmask 392192  }
   0x3   :  { %1340 = vmatprep.subr.mxu0 %v1502_v0  ;;  %v22_v7 = vld [vmem:[%s1781_s2 + $0x8] sm:$0xff]  ;;  %v21_v8 = vld [vmem:[%s1781_s2] sm:$0xff]  ;;  %v143_v30 = vld [vmem:[%s1783_s3 + $0x50] sm:$0xff] }
   0x4   :  { %1341 = vmatpush3.msra.mxu0 %v27_v2  ;;  %v20_v9 = vld [vmem:[%s1782_s1] sm:$0x3]  ;;  %s1505_s1 = smov 64   ;;  %v142_v29 = vld [vmem:[%s1783_s3 + $0x48] sm:$0xff]  ;;  %v156_v31 = vld [vmem:[%s1784_s0 + $0x38] sm:$0xff] }
   0x5   :  { %1342 = vmatprep.subr.mxu0 %v1502_v0  ;;  %v1224_v10 = vld [vmem:[%s1781_s2 + $0x40] ss:$0 sm:$0xff]  ;;  %s1506_s2 = smov 96   ;;  %v155_v32 = vld [vmem:[%s1784_s0 + $0x30] sm:$0xff]  ;;  %1357 = vmatprep.subr.mxu1 %v156_v31  ;;  %v144_v33 = vld [vmem:[%s1783_s3 + $0x58] sm:$0xff] }
   0x6   :  { %1343 = vmatpush3.msra.mxu0 %v26_v3  ;;  %v141_v23 = vld [vmem:[%s1783_s3 + $0x40] sm:$0xff]  ;;  %1358 = vmatpush3.msra.mxu1 %v156_v31  ;;  %v154_v34 = vld [vmem:[%s1784_s0 + $0x28] sm:$0xff]  ;;  %v1618_v37 = vld [vmem:[%s1784_s0 + $0x18] sm:$0xff] }
   0x7   :  { %1344 = vmatprep.subr.mxu0 %v1502_v0  ;;  %1359 = vmatprep.subr.mxu1 %v155_v32  ;;  %v153_v35 = vld [vmem:[%s1784_s0 + $0x20] sm:$0xff]  ;;  %v1623_v38 = vld [vmem:[%s1784_s0 + $0x10] sm:$0xff]  ;;  %v1632_v39 = vld [vmem:[%s1784_s0 + $0x8] sm:$0xff] }
   0x8   :  { %1345 = vmatpush3.msra.mxu0 %v25_v4  ;;  %1360 = vmatpush3.msra.mxu1 %v155_v32  ;;  %v1613_v36 = vld [vmem:[%s1783_s3 + $0x60] sm:$0x1]  ;;  %v134_v43 = vld [vmem:[%s1783_s3 + $0x8] sm:$0xff]  ;;  %v1661_v44 = vld [vmem:[%s1785_s4 + $0x10] sm:$0x3] }
   0x9   :  { %1346 = vmatprep.subr.mxu0 %v1502_v0  ;;  %1361 = vmatprep.subr.mxu1 %v154_v34  ;;  %v1639_v40 = vld [vmem:[%s1784_s0] sm:$0xff]  ;;  %v135_v45 = vld [vmem:[%s1783_s3 + $0x10] sm:$0xff]  ;;  %v136_v46 = vld [vmem:[%s1783_s3 + $0x18] sm:$0xff]  ;;  %vm572_vm5 = vcmp.gt.f32.partialorder %v1661_v44, 0.0 }
   0xa   :  { %1347 = vmatpush3.msra.mxu0 %v24_v5  ;;  %1362 = vmatpush3.msra.mxu1 %v154_v34  ;;  %v133_v42 = vld [vmem:[%s1783_s3] sm:$0xff]  ;;  %v138_v52 = vld [vmem:[%s1783_s3 + $0x28] sm:$0xff]  ;;  %v139_v53 = vld [vmem:[%s1783_s3 + $0x30] sm:$0xff] }
   0xb   :  { %1348 = vmatprep.subr.mxu0 %v1502_v0  ;;  %1363 = vmatprep.subr.mxu1 %v153_v35  ;;  %v137_v51 = vld [vmem:[%s1783_s3 + $0x20] sm:$0xff]  ;;  %v140_v54 = vld [vmem:[%s1783_s3 + $0x38] sm:$0xff] }
   0xc   :  { %1349 = vmatpush3.msra.mxu0 %v23_v6  ;;  %1364 = vmatpush3.msra.mxu1 %v153_v35 }
   0xd   :  { %1350 = vmatprep.subr.mxu0 %v1502_v0  ;;  %1365 = vmatprep.subr.mxu1 %v1618_v37 }
   0xe   :  { %1351 = vmatpush3.msra.mxu0 %v22_v7  ;;  %1366 = vmatpush3.msra.mxu1 %v1618_v37 }
   0xf   :  { %1352 = vmatprep.subr.mxu0 %v1502_v0  ;;  %1367 = vmatprep.subr.mxu1 %v1623_v38 }
  0x10   :  { %1353 = vmatpush3.msra.mxu0 %v21_v8  ;;  %1368 = vmatpush3.msra.mxu1 %v1623_v38 }
  0x11   :  { %1355 = vmatmul.mubr.msk.f32.vlgmr.msra.gmra.mxu0 %vm34_vm1, %v20_v9  ;;  %1369 = vmatprep.subr.mxu1 %v1632_v39 }
  0x12   :  { %1387 = vmatprep.mubr.msk.f32.mxu0 %vm289_vm2, %v141_v23  ;;  %1370 = vmatpush3.msra.mxu1 %v1632_v39 }
  0x13   :  { %1371 = vmatprep.subr.mxu1 %v1639_v40  ;;  %1373 = vmatprep.mubr.msk.f32.mxu1 %vm34_vm1, %v133_v42 }
  0x14   :  { %1372 = vmatpush3.msra.mxu1 %v1639_v40 }
  0x15   :  { %1401 = vmatprep.subr.mxu1 %v1502_v0  ;;  %1374 = vmatmul.mubr.msk.f32.vlgmr.msra.gmra.mxu1 %vm34_vm1, %v134_v43 }
  0x16   :  { %1376 = vmatprep.mubr.msk.f32.mxu1 %vm34_vm1, %v135_v45 }
  0x19   :  { %1377 = vmatmul.mubr.msk.f32.gmra.mxu1 %vm34_vm1, %v136_v46 }
  0x1a   :  { %1379 = vmatprep.mubr.msk.f32.mxu1 %vm34_vm1, %v137_v51 }
  0x1d   :  { %1380 = vmatmul.mubr.msk.f32.gmra.mxu1 %vm34_vm1, %v138_v52 }
  0x1e   :  { %1382 = vmatprep.mubr.msk.f32.mxu1 %vm34_vm1, %v139_v53 }
  0x21   :  { %1383 = vmatmul.mubr.msk.f32.gmra.mxu1 %vm34_vm1, %v140_v54 }
  0x22   :  { %1409 = vmatprep.mubr.msk.f32.mxu1 %vm1503_vm0, %v1502_v0 }
  0xd1   :  { %v104_v11 = vpop.f32.mrf.mxu0 }
  0xd2   :  { %v105_v12 = vadd.f32 %v1224_v10, %v104_v11 }
  0xd3   :  { %v1356_v13 = vpop.f32.mrf.mxu0 }
  0xd4   :  { %115 = vrot.lane.b32.xlu0 %v105_v12, %s1504_s13  ;;  %v1226_v14 = vmul.f32 -1.442695, %v105_v12 }
  0xd5   :  { %v1375_v55 = vpop.f32.mrf.mxu1 }
  0xd6   :  { %1476 = vpow2.f32 %v1226_v14 }
  0xd7   :  { %v247_v56 = vpop.f32.mrf.mxu1 }
  0xd9   :  { %v1378_v58 = vpop.f32.mrf.mxu1 }
  0xdb   :  { %v257_v62 = vpop.f32.mrf.mxu1 }
  0xdd   :  { %v1715_v8 = vpop.f32.mrf.mxu1 }
  0xdf   :  { %v1717_v10 = vpop.f32.mrf.mxu1 }
  0xe3   :  { %v1477_v15 = vpop.eup %1476 }
  0xe4   :  { %v111_v16 = vadd.f32 1.0, %v1477_v15 }
  0xe6   :  { %1478 = vrcp.f32 %v111_v16 }
  0xf3   :  { %v1479_v17 = vpop.eup %1478 }
  0xf4   :  { %v125_v24 = vsub.f32 1.0, %v1479_v17  ;;  %v131_v26 = vmul.f32 %v1479_v17, %v20_v9  ;;  %v573_v9 = vlaneseq }
  0xf6   :  { %v574_v11 = vshrl.u32 %v573_v9, 7 }
  0xf8   :  { %v1721_v13 = vsub.s32 0, %v574_v11 }
 0x146   :  { %v116_v18 = vpop.permute.xlu0 %115 }
 0x147   :  { %v118_v19 = vmul.f32 %v1479_v17, %v116_v18 }
 0x149   :  { %120 = vrot.lane.b32.xlu0 %v118_v19, %s1505_s1 }
 0x1bb   :  { %v121_v20 = vpop.permute.xlu0 %120 }
 0x1bc   :  { %v123_v21 = vadd.f32 %v121_v20, %v105_v12  ;;  %v1719_v12 = vpop.f32.mrf.mxu1 }
 0x1be   :  { %1480 = vtanh.f32 %v123_v21  ;;  %v1723_v14 = vpop.f32.mrf.mxu1 }
 0x1cb   :  { %v1481_v22 = vpop.eup %1480 }
 0x1cc   :  { %127 = vrot.lane.b32.xlu1 %v1481_v22, %s1506_s2 }
 0x23e   :  { %v128_v25 = vpop.permute.xlu1 %127 }
 0x23f   :  { %v130_v27 = vmul.f32 %v128_v25, %v125_v24 }
 0x241   :  { %v132_v28 = vadd.f32 %v131_v26, %v130_v27 }
 0x243   :  { %287 = vrot.lane.b32.xlu1 %v132_v28, %s1506_s2 }
 0x247   :  { %848 = vrot.lane.b32.xlu1 %v141_v23, %s1506_s2 }
 0x24b   :  { %850 = vrot.lane.b32.xlu1 %v142_v29, %s1506_s2 }
 0x24f   :  { %852 = vrot.lane.b32.xlu1 %v143_v30, %s1506_s2 }
 0x253   :  { %854 = vrot.lane.b32.xlu1 %v144_v33, %s1506_s2 }
 0x257   :  { %1054 = vrot.lane.b32.xlu1 %v1613_v36, %s1506_s2 }
 0x25b   :  { %1212 = vrot.lane.b32.xlu1 %v132_v28, %s1507_s14 }
 0x2b5   :  { %v288_v41 = vpop.permute.xlu1 %287 }
 0x2b6   :  { %1385 = vmatprep.subr.msk.mxu0 %vm289_vm2, %v288_v41 }
 0x2b7   :  { %1386 = vmatpush3.xpose.msk.msra.mxu0 %vm289_vm2, %v288_v41 }
 0x2b8   :  { %1393 = vmatprep.subr.msk.mxu0 %vm402_vm3, %v1661_v44 }
 0x2ba   :  { %1388 = vmatmul.mubr.msk.f32.vlgmr.msra.gmra.mxu0 %vm289_vm2, %v142_v29 }
 0x2bb   :  { %1390 = vmatprep.mubr.msk.f32.mxu0 %vm289_vm2, %v143_v30  ;;  %1394 = vmatpush3.msk.msra.mxu0 %vm402_vm3, %v1661_v44 }
 0x2bc   :  { %1412 = vmatprep.subr.mxu0 %v1502_v0 }
 0x2be   :  { %1391 = vmatmul.mubr.msk.f32.gmra.mxu0 %vm289_vm2, %v144_v33  ;;  %v849_v33 = vpop.permute.xlu1 %848 }
 0x37a   :  { %v1389_v47 = vpop.f32.mrf.mxu0 }
 0x37c   :  { %v370_v48 = vpop.f32.mrf.mxu0 }
 0x37d   :  { %1395 = vmatprep.mubr.msk.f32.mxu0 %vm389_vm4, %v370_v48 }
 0x37e   :  { %v1392_v49 = vpop.f32.mrf.mxu0  ;;  %1396 = vmatmul.mubr.msk.f32.vlgmr.msra.gmra.mxu0 %vm389_vm4, %v1389_v47 }
 0x37f   :  { %1413 = vmatpush3.xpose.msk.msra.mxu0 %vm289_vm2, %v1661_v44 }
 0x380   :  { %v380_v50 = vpop.f32.mrf.mxu0  ;;  %1422 = vmatprep.subr.msk.mxu0 %vm289_vm2, %v1661_v44 }
 0x381   :  { %1398 = vmatprep.mubr.msk.f32.mxu0 %vm389_vm4, %v380_v50 }
 0x382   :  { %1399 = vmatmul.mubr.msk.f32.gmra.mxu0 %vm389_vm4, %v1392_v49 }
 0x383   :  { %1414 = vmatprep.mubr.msk.f32.mxu0 %vm1503_vm0, %v1502_v0 }
 0x43e   :  { %v1397_v57 = vpop.f32.mrf.mxu0 }
 0x43f   :  { %v492_v1 = vadd.f32 %v1397_v57, %v1375_v55 }
 0x440   :  { %v472_v59 = vpop.f32.mrf.mxu0 }
 0x441   :  { %v491_v3 = vadd.f32 %v472_v59, %v247_v56  ;;  %v147_v56 = vld [vmem:[%s1785_s4 + $0x8] sm:$0xff] }
 0x442   :  { %v1400_v60 = vpop.f32.mrf.mxu0 }
 0x443   :  { %v494_v61 = vadd.f32 %v1400_v60, %v1378_v58 }
 0x444   :  { %v482_v63 = vpop.f32.mrf.mxu0 }
 0x445   :  { %1482 = vtanh.f32 %v494_v61  ;;  %v493_v2 = vadd.f32 %v482_v63, %v257_v62 }
 0x447   :  { %1484 = vtanh.f32 %v493_v2 }
 0x448   :  { %1486 = vtanh.f32 %v492_v1 }
 0x449   :  { %1488 = vtanh.f32 %v491_v3 }
 0x452   :  { %v1483_v4 = vpop.eup %1482 }
 0x453   :  { %1402 = vmatpush3.msra.mxu1 %v1483_v4 }
 0x454   :  { %v1485_v5 = vpop.eup %1484  ;;  %1403 = vmatprep.subr.mxu1 %v1502_v0 }
 0x455   :  { %1404 = vmatpush3.msra.mxu1 %v1485_v5  ;;  %v1487_v6 = vpop.eup %1486 }
 0x456   :  { %1405 = vmatprep.subr.mxu1 %v1502_v0  ;;  %v1489_v7 = vpop.eup %1488 }
 0x457   :  { %1406 = vmatpush3.msra.mxu1 %v1487_v6 }
 0x458   :  { %1407 = vmatprep.subr.mxu1 %v1502_v0 }
 0x459   :  { %1408 = vmatpush3.msra.mxu1 %v1489_v7  ;;  %v146_v7 = vld [vmem:[%s1785_s4] sm:$0xff] }
 0x45a   :  { %1410 = vmatmul.mubr.msk.f32.vlgmr.msra.gmra.mxu1 %vm289_vm2, %v1613_v36  ;;  %1417 = vmatprep.subr.mxu1 %v1502_v0 }
 0x45b   :  { %1418 = vmatpush3.msk.msra.mxu1 %vm402_vm3, %v1661_v44  ;;  %1419 = vmatprep.mubr.msk.f32.mxu1 %vm1503_vm0, %v1502_v0 }
 0x51a   :  { %v568_v15 = vpop.f32.mrf.mxu1 }
 0x51b   :  { %v576_v16 = vrot.slane %v568_v15, %v1721_v13 }
 0x51c   :  { %v1411_v17 = vpop.f32.mrf.mxu1 }
 0x51d   :  { %v577_v18 = vsel %vm572_vm5, %v576_v16, -inf }
 0x51e   :  { %v579_v19 = vsel %vm578_vm6, %v577_v18, -inf }
 0x51f   :  { %580 = vmax.xlane.f32.xlu0 %v579_v19 }
 0x5a8   :  { %v581_v20 = vpop.xlane.xlu0 %580 }
 0x5a9   :  { %v582_v21 = vsel %vm572_vm5, %v581_v20, 0.0 }
 0x5aa   :  { %v583_v22 = vsel %vm578_vm6, %v582_v21, 0.0 }
 0x5ab   :  { %v584_v23 = vrot.slane %v583_v22, 4 }
 0x5ad   :  { %v585_v24 = vadd.f32 %v584_v23, %v583_v22 }
 0x5af   :  { %v586_v25 = vrot.slane %v585_v24, 2 }
 0x5b1   :  { %v587_v26 = vadd.f32 %v586_v25, %v585_v24 }
 0x5b3   :  { %v588_v27 = vrot.slane %v587_v26, 1 }
 0x5b5   :  { %v589_v28 = vadd.f32 %v588_v27, %v587_v26 }
 0x5b7   :  { %v590_v29 = vsub.f32 %v568_v15, %v589_v28 }
 0x5b9   :  { %v591_v30 = vmul.f32 1.442695, %v590_v29 }
 0x5bb   :  { %1490 = vpow2.f32 %v591_v30 }
 0x5c8   :  { %v1491_v31 = vpop.eup %1490 }
 0x5c9   :  { %1415 = vmatmul.mubr.msk.f32.vlgmr.msra.gmra.mxu0 %vm289_vm2, %v1491_v31 }
 0x5ca   :  { %1423 = vmatpush3.xpose.msk.msra.mxu0 %vm289_vm2, %v1661_v44 }
 0x5cb   :  { %1444 = vmatprep.subr.msk.mxu0 %vm402_vm3, %v1661_v44 }
 0x689   :  { %v664_v32 = vpop.f32.mrf.mxu0 }
 0x68a   :  { %1420 = vmatmul.mubr.msk.f32.vlgmr.msra.gmra.mxu1 %vm389_vm4, %v664_v32 }
 0x68b   :  { %v1416_v34 = vpop.f32.mrf.mxu0  ;;  %1438 = vmatprep.mubr.msk.f32.mxu1 %vm289_vm2, %v849_v33 }
 0x74a   :  { %v737_v35 = vpop.f32.mrf.mxu1 }
 0x74b   :  { %1492 = vrcp.f32 %v737_v35 }
 0x74c   :  { %v1421_v36 = vpop.f32.mrf.mxu1 }
 0x758   :  { %v1493_v41 = vpop.eup %1492 }
 0x759   :  { %v742_v42 = vmul.f32 %v1493_v41, %v1491_v31 }
 0x75b   :  { %v746_v43 = vrot.slane %v742_v42, %v1721_v13 }
 0x75d   :  { %v747_v45 = vmul.f32 %v746_v43, %v1639_v40  ;;  %v748_v46 = vmul.f32 %v746_v43, %v1632_v39  ;;  %v749_v47 = vmul.f32 %v746_v43, %v1623_v38  ;;  %v750_v48 = vmul.f32 %v746_v43, %v1618_v37  ;;  %v851_v39 = vpop.permute.xlu1 %850 }
 0x75f   :  { %1424 = vmatprep.mubr.msk.f32.mxu0 %vm289_vm2, %v747_v45 }
 0x760   :  { %1425 = vmatmul.mubr.msk.f32.vlgmr.msra.gmra.mxu0 %vm289_vm2, %v748_v46 }
 0x761   :  { %1427 = vmatprep.mubr.msk.f32.mxu0 %vm289_vm2, %v749_v47  ;;  %1445 = vmatpush3.msk.msra.mxu0 %vm402_vm3, %v1661_v44  ;;  %v853_v38 = vpop.permute.xlu1 %852 }
 0x762   :  { %1463 = vmatprep.subr.mxu0 %v1502_v0 }
 0x764   :  { %1428 = vmatmul.mubr.msk.f32.gmra.mxu0 %vm289_vm2, %v750_v48 }
 0x765   :  { %v855_v37 = vpop.permute.xlu1 %854 }
 0x769   :  { %v1055_v6 = vpop.permute.xlu1 %1054 }
 0x820   :  { %v1426_v40 = vpop.f32.mrf.mxu0 }
 0x822   :  { %v829_v49 = vpop.f32.mrf.mxu0 }
 0x824   :  { %v1429_v50 = vpop.f32.mrf.mxu0 }
 0x825   :  { %1430 = vmatprep.subr.mxu1 %v1429_v50 }
 0x826   :  { %v839_v51 = vpop.f32.mrf.mxu0  ;;  %1431 = vmatpush3.msra.mxu1 %v1429_v50 }
 0x827   :  { %1432 = vmatprep.subr.mxu1 %v839_v51 }
 0x828   :  { %1433 = vmatpush3.msra.mxu1 %v839_v51 }
 0x829   :  { %1434 = vmatprep.subr.mxu1 %v1426_v40 }
 0x82a   :  { %1435 = vmatpush3.msra.mxu1 %v1426_v40 }
 0x82b   :  { %1436 = vmatprep.subr.mxu1 %v829_v49 }
 0x82c   :  { %1437 = vmatpush3.msra.mxu1 %v829_v49 }
 0x82d   :  { %1439 = vmatmul.mubr.msk.f32.vlgmr.msra.gmra.mxu1 %vm289_vm2, %v851_v39  ;;  %1452 = vmatprep.subr.mxu1 %v1502_v0 }
 0x82e   :  { %1441 = vmatprep.mubr.msk.f32.mxu1 %vm289_vm2, %v853_v38 }
 0x831   :  { %1442 = vmatmul.mubr.msk.f32.gmra.mxu1 %vm289_vm2, %v855_v37 }
 0x832   :  { %1460 = vmatprep.mubr.msk.f32.mxu1 %vm1503_vm0, %v1502_v0 }
 0x8ed   :  { %v1440_v52 = vpop.f32.mrf.mxu1 }
 0x8ef   :  { %v930_v53 = vpop.f32.mrf.mxu1 }
 0x8f0   :  { %1446 = vmatprep.mubr.msk.f32.mxu0 %vm389_vm4, %v930_v53 }
 0x8f1   :  { %v1443_v54 = vpop.f32.mrf.mxu1  ;;  %1447 = vmatmul.mubr.msk.f32.vlgmr.msra.gmra.mxu0 %vm389_vm4, %v1440_v52 }
 0x8f2   :  { %1464 = vmatpush3.xpose.msk.msra.mxu0 %vm289_vm2, %v147_v56 }
 0x8f3   :  { %v940_v55 = vpop.f32.mrf.mxu1  ;;  %1465 = vmatprep.subr.mxu0 %v1502_v0 }
 0x8f4   :  { %1449 = vmatprep.mubr.msk.f32.mxu0 %vm389_vm4, %v940_v55 }
 0x8f5   :  { %1450 = vmatmul.mubr.msk.f32.gmra.mxu0 %vm389_vm4, %v1443_v54 }
 0x8f6   :  { %1467 = vmatprep.mubr.msk.f32.mxu0 %vm1503_vm0, %v1502_v0  ;;  %1466 = vmatpush3.xpose.msk.msra.mxu0 %vm289_vm2, %v146_v7 }
 0x9b1   :  { %v1448_v57 = vpop.f32.mrf.mxu0 }
 0x9b2   :  { %v1047_v62 = vadd.f32 %v1448_v57, %v1715_v8 }
 0x9b3   :  { %v1027_v58 = vpop.f32.mrf.mxu0 }
 0x9b4   :  { %v1046_v1 = vadd.f32 %v1027_v58, %v1717_v10 }
 0x9b5   :  { %v1451_v59 = vpop.f32.mrf.mxu0 }
 0x9b6   :  { %v1049_v60 = vadd.f32 %v1451_v59, %v1719_v12 }
 0x9b7   :  { %v1037_v61 = vpop.f32.mrf.mxu0 }
 0x9b8   :  { %1494 = vtanh.f32 %v1049_v60  ;;  %v1048_v63 = vadd.f32 %v1037_v61, %v1723_v14 }
 0x9ba   :  { %1496 = vtanh.f32 %v1048_v63 }
 0x9bb   :  { %1498 = vtanh.f32 %v1047_v62 }
 0x9bc   :  { %1500 = vtanh.f32 %v1046_v1 }
 0x9c5   :  { %v1495_v2 = vpop.eup %1494 }
 0x9c6   :  { %1453 = vmatpush3.msra.mxu1 %v1495_v2 }
 0x9c7   :  { %v1497_v3 = vpop.eup %1496  ;;  %1454 = vmatprep.subr.mxu1 %v1502_v0 }
 0x9c8   :  { %1455 = vmatpush3.msra.mxu1 %v1497_v3  ;;  %v1499_v4 = vpop.eup %1498 }
 0x9c9   :  { %1456 = vmatprep.subr.mxu1 %v1502_v0  ;;  %v1501_v5 = vpop.eup %1500 }
 0x9ca   :  { %1457 = vmatpush3.msra.mxu1 %v1499_v4 }
 0x9cb   :  { %1458 = vmatprep.subr.mxu1 %v1502_v0  ;;  %v1213_v0 = vpop.permute.xlu1 %1212 }
 0x9cc   :  { %1459 = vmatpush3.msra.mxu1 %v1501_v5 }
 0x9cd   :  { %1461 = vmatmul.mubr.msk.f32.vlgmr.msra.gmra.mxu1 %vm289_vm2, %v1055_v6 }
 0xa8d   :  { %v1124_v8 = vpop.f32.mrf.mxu1 }
 0xa8e   :  { %v1131_v9 = vrot.slane %v1124_v8, %v1721_v13 }
 0xa8f   :  { %v1462_v10 = vpop.f32.mrf.mxu1 }
 0xa90   :  { %v1132_v11 = vmul.f32 %v1131_v9, %v1661_v44 }
 0xa92   :  { %1468 = vmatmul.mubr.msk.f32.vlgmr.msra.gmra.mxu0 %vm289_vm2, %v1132_v11 }
 0xb52   :  { %v1208_v12 = vpop.f32.mrf.mxu0 }
 0xb53   :  { %v1216_v14 = vsel %vm1215_vm7, %v1208_v12, %v1213_v0 }
 0xb54   :  { %v1218_v15 = vsel %vm1217_vm8, %v1216_v14, 0.0  ;;  %v1469_v16 = vpop.f32.mrf.mxu0 }
 0xb55   :  { %1219 = vst [vmem:[%s1786_s5] sm:$0x3] %v1218_v15 }

</bundles_post_ra>
